<compile_context>
chip_gen: v6e
topology: v6e:2x2x1
jax: 0.10.0
libtpu: 0.0.40
codegen_flags: <defaults>
</compile_context>

<pallas_src>
import jax
import jax.numpy as jnp
from jax.experimental import pallas as pl
from jax.experimental.pallas import tpu as pltpu

NEG_SLOPE = 0.01                      # F.leaky_relu default
_LANE = 128                           # TPU lane width
_SUBLANE = 8                          # f32 sublane group / padded hidden width
_VMEM_BUDGET = 32 * 1024 * 1024       # target live bytes per TensorCore
_VMEM_LIMIT = 48 * 1024 * 1024        # scoped VMEM limit (v7x has 64 MiB/TC)


def _leaky_relu(x):
    return jnp.where(x > 0, x, NEG_SLOPE * x)


def _round_up(n, m):
    return (n + m - 1) // m * m


def _net_kernel(x_ref, w1p_ref, w2p_ref, w3p_ref, o_ref):
    # x_ref  : (tile_b, F) streamed input tile (bf16/f32), row-major as in HBM
    # w1p_ref: (8, F)  fc1 weight^T zero-padded to 8 rows, x dtype, VMEM-resident
    # w2p_ref: (8, 8)  fc2 weight^T zero-padded (rows 0..2 / cols 0..4 used), f32
    # w3p_ref: (8, 8)  fc3 weight^T zero-padded (row 0 / cols 0..2 used), f32
    # o_ref  : (1, tile_b) sigmoid output tile, f32 (lane-dense store)

    # Layer 1 on the MXU. Contracting over F with x as the transposed rhs puts the
    # batch straight onto the lane axis: (8, F) . (tile_b, F)^T -> (8, tile_b).
    h1t = jax.lax.dot_general(
        w1p_ref[...], x_ref[...],
        dimension_numbers=(((1,), (1,)), ((), ())),
        preferred_element_type=jnp.float32)
    h1t = _leaky_relu(h1t)                          # padded rows 5..7 stay exactly 0

    # Layers 2 & 3 on the MXU (the vex slot has slack; M = K = 8 is tiny). Zero
    # padding keeps the extra rows/cols inert since leaky_relu(0) == 0.
    h2t = _leaky_relu(jnp.dot(w2p_ref[...], h1t,
                              preferred_element_type=jnp.float32))   # (8, tile_b)
    h3t = jnp.dot(w3p_ref[...], h2t, preferred_element_type=jnp.float32)

    o_ref[...] = jax.nn.sigmoid(h3t[0:1, :]).astype(o_ref.dtype)     # lane-dense


def net_forward(x, w1, w2, w3, *, max_tile_b=32768):
    """x: (B, F); w1: (F, 5); w2: (5, 3); w3: (3, 1) in (in_dim, out_dim) layout.

    Returns sigmoid(leaky(leaky(x @ w1) @ w2) @ w3), shape (B, 1), float32."""
    B, F = x.shape

    # Tiny one-time weight plumbing: transpose + zero-pad to MXU-friendly shapes.
    w1p = jnp.zeros((_SUBLANE, F), x.dtype).at[:5, :].set(w1.T.astype(x.dtype))
    w2p = jnp.zeros((_SUBLANE, _SUBLANE), jnp.float32).at[:3, :5].set(
        w2.T.astype(jnp.float32))
    w3p = jnp.zeros((_SUBLANE, _SUBLANE), jnp.float32).at[:1, :3].set(
        w3.T.astype(jnp.float32))

    # Batch tile: as large as the VMEM budget allows (per-grid-step overhead is
    # ~0.35 us, so big lane-dense tiles track the HBM roofline).
    per_row = (2 * F * x.dtype.itemsize          # double-buffered x block
               + 3 * _SUBLANE * 4                # h1t/h2t/h3t f32 intermediates
               + 2 * 4)                          # double-buffered f32 output row
    tile_cap = max(_LANE, _VMEM_BUDGET // per_row // _LANE * _LANE)
    tile_b = min(max_tile_b, tile_cap, _round_up(B, _LANE))
    # TODO(synk): for very large F, add an "arbitrary" F-chunk grid axis with an
    # f32 accumulator instead of letting tile_b collapse toward 128 lanes.

    grid = (pl.cdiv(B, tile_b),)

    flops = 2 * B * (F * 8 + 8 * 8 + 8 * 8)
    bytes_accessed = (B * F * x.dtype.itemsize + B * 4
                      + _SUBLANE * F * x.dtype.itemsize + 2 * 64 * 4)

    out = pl.pallas_call(
        _net_kernel,
        out_shape=jax.ShapeDtypeStruct((1, B), jnp.float32),
        grid=grid,
        in_specs=[
            pl.BlockSpec((tile_b, F), lambda i: (i, 0)),            # streamed x tile
            pl.BlockSpec((_SUBLANE, F), lambda i: (0, 0)),          # resident fc1 wt
            pl.BlockSpec((_SUBLANE, _SUBLANE), lambda i: (0, 0)),   # resident fc2 wt
            pl.BlockSpec((_SUBLANE, _SUBLANE), lambda i: (0, 0)),   # resident fc3 wt
        ],
        out_specs=pl.BlockSpec((1, tile_b), lambda i: (0, i)),      # lane-dense out
        compiler_params=pltpu.CompilerParams(
            dimension_semantics=("parallel",),      # v7x: both TCs split the batch
            vmem_limit_bytes=_VMEM_LIMIT,           # > v5e's 16 MiB scoped default
        ),
        cost_estimate=pl.CostEstimate(
            flops=flops, transcendentals=B, bytes_accessed=bytes_accessed),
    )(x, w1p, w2p, w3p)

    return out.reshape(B, 1)


def net_forward_ref(x, w1, w2, w3):
    hp = jax.lax.Precision.HIGHEST
    h1 = _leaky_relu(jnp.dot(x, w1, precision=hp))
    h2 = _leaky_relu(jnp.dot(h1, w2, precision=hp))
    return jax.nn.sigmoid(jnp.dot(h2, w3, precision=hp))


def init_params(key, n_features):
    # Mimics torch.nn.Linear's U(-1/sqrt(in), 1/sqrt(in)), stored as (in, out).
    k1, k2, k3 = jax.random.split(key, 3)

    def unif(k, in_dim, out_dim):
        bound = 1.0 / jnp.sqrt(jnp.float32(in_dim))
        return jax.random.uniform(k, (in_dim, out_dim), jnp.float32,
                                  minval=-bound, maxval=bound)

    return unif(k1, n_features, 5), unif(k2, 5, 3), unif(k3, 3, 1)


if __name__ == "__main__":
    key = jax.random.PRNGKey(0)
    kx, kp = jax.random.split(key)

    batch, n_features = 8, 32
    x = jax.random.normal(kx, (batch, n_features), jnp.float32)
    w1, w2, w3 = init_params(kp, n_features)

    # Stream x in bf16 (halves HBM bytes of the only large array). Snap the tiny
    # weights to bf16-representable values so the in-kernel bf16 MXU products of
    # layer 1 are exact and match the f32 reference matmuls.
    x_bf16 = x.astype(jnp.bfloat16)
    w1, w2, w3 = tuple(w.astype(jnp.bfloat16).astype(jnp.float32)
                       for w in (w1, w2, w3))

    fwd = jax.jit(net_forward)
    out = jax.block_until_ready(fwd(x_bf16, w1, w2, w3))

    ref = net_forward_ref(x_bf16.astype(jnp.float32), w1, w2, w3)

    assert out.shape == (batch, 1)
    # Typical agreement is ~1e-6; the loose bound only guards against the
    # backend's choice of bf16-pass decomposition for the tiny f32 layer-2/3
    # matmuls on the MXU.
    assert jnp.allclose(out, ref, atol=1e-3, rtol=1e-3), (out, ref)
    print("KERNEL_OK")
</pallas_src>

<mosaic_0001>
module attributes {stable_mosaic.version = 11 : i64} {
  func.func @_net_kernel(%arg0: i32, %arg1: memref<128x32xbf16, #tpu.memory_space<vmem>>, %arg2: memref<8x32xbf16, #tpu.memory_space<vmem>>, %arg3: memref<8x8xf32, #tpu.memory_space<vmem>>, %arg4: memref<8x8xf32, #tpu.memory_space<vmem>>, %arg5: memref<1x128xf32, #tpu.memory_space<vmem>>) attributes {dimension_semantics = [#tpu.dimension_semantics<parallel>], iteration_bounds = array<i64: 1>, scalar_prefetch = 0 : i64, scratch_operands = 0 : i64, tpu.core_type = #tpu.core_type<tc>, window_params = [{transform_indices = @transform_0, window_bounds = array<i64: 128, 32>}, {pipeline_mode = #tpu.pipeline_mode<synchronous>, transform_indices = @transform_1, window_bounds = array<i64: 8, 32>}, {pipeline_mode = #tpu.pipeline_mode<synchronous>, transform_indices = @transform_2, window_bounds = array<i64: 8, 8>}, {pipeline_mode = #tpu.pipeline_mode<synchronous>, transform_indices = @transform_3, window_bounds = array<i64: 8, 8>}, {transform_indices = @transform_4, window_bounds = array<i64: 1, 128>}]} {
    %c0 = arith.constant 0 : index
    %c0_0 = arith.constant 0 : index
    %0 = vector.load %arg2[%c0, %c0_0] : memref<8x32xbf16, #tpu.memory_space<vmem>>, vector<8x32xbf16>
    %c0_1 = arith.constant 0 : index
    %c0_2 = arith.constant 0 : index
    %1 = vector.load %arg1[%c0_1, %c0_2] : memref<128x32xbf16, #tpu.memory_space<vmem>>, vector<128x32xbf16>
    %cst = arith.constant dense<0.000000e+00> : vector<8x128xf32>
    %2 = tpu.matmul %0, %1, %cst {dimension_numbers = #tpu.dot_dimension_numbers<[1], [1], [0], [0], [0, 0, 1, 0], [], []>} : vector<8x32xbf16>, vector<128x32xbf16>, vector<8x128xf32> -> vector<8x128xf32>
    %cst_3 = arith.constant 0.000000e+00 : f32
    %3 = vector.broadcast %cst_3 : f32 to vector<8x128xf32>
    %4 = arith.cmpf ogt, %2, %3 : vector<8x128xf32>
    %cst_4 = arith.constant 0.00999999977 : f32
    %5 = vector.broadcast %cst_4 : f32 to vector<8x128xf32>
    %6 = arith.mulf %5, %2 : vector<8x128xf32>
    %7 = arith.select %4, %2, %6 : vector<8x128xi1>, vector<8x128xf32>
    %c0_5 = arith.constant 0 : index
    %c0_6 = arith.constant 0 : index
    %8 = vector.load %arg3[%c0_5, %c0_6] : memref<8x8xf32, #tpu.memory_space<vmem>>, vector<8x8xf32>
    %cst_7 = arith.constant dense<0.000000e+00> : vector<8x128xf32>
    %9 = tpu.matmul %8, %7, %cst_7 {dimension_numbers = #tpu.dot_dimension_numbers<[1], [0], [0], [1], [0, 0, 1, 1], [], []>} : vector<8x8xf32>, vector<8x128xf32>, vector<8x128xf32> -> vector<8x128xf32>
    %cst_8 = arith.constant 0.000000e+00 : f32
    %10 = vector.broadcast %cst_8 : f32 to vector<8x128xf32>
    %11 = arith.cmpf ogt, %9, %10 : vector<8x128xf32>
    %cst_9 = arith.constant 0.00999999977 : f32
    %12 = vector.broadcast %cst_9 : f32 to vector<8x128xf32>
    %13 = arith.mulf %12, %9 : vector<8x128xf32>
    %14 = arith.select %11, %9, %13 : vector<8x128xi1>, vector<8x128xf32>
    %c0_10 = arith.constant 0 : index
    %c0_11 = arith.constant 0 : index
    %15 = vector.load %arg4[%c0_10, %c0_11] : memref<8x8xf32, #tpu.memory_space<vmem>>, vector<8x8xf32>
    %cst_12 = arith.constant dense<0.000000e+00> : vector<8x128xf32>
    %16 = tpu.matmul %15, %14, %cst_12 {dimension_numbers = #tpu.dot_dimension_numbers<[1], [0], [0], [1], [0, 0, 1, 1], [], []>} : vector<8x8xf32>, vector<8x128xf32>, vector<8x128xf32> -> vector<8x128xf32>
    %17 = vector.extract_strided_slice %16 {offsets = [0, 0], sizes = [1, 128], strides = [1, 1]} : vector<8x128xf32> to vector<1x128xf32>
    %18 = arith.negf %17 : vector<1x128xf32>
    %19 = math.exp %18 : vector<1x128xf32>
    %cst_13 = arith.constant 1.000000e+00 : f32
    %20 = vector.broadcast %cst_13 : f32 to vector<1x128xf32>
    %21 = arith.addf %20, %19 : vector<1x128xf32>
    %22 = arith.divf %20, %21 : vector<1x128xf32>
    %c0_14 = arith.constant 0 : index
    %c0_15 = arith.constant 0 : index
    %23 = vector.load %arg5[%c0_14, %c0_15] : memref<1x128xf32, #tpu.memory_space<vmem>>, vector<1x128xf32>
    tpu.vector_store %arg5[%c0_14, %c0_15], %22 {strides = array<i32>} : memref<1x128xf32, #tpu.memory_space<vmem>>, vector<1x128xf32>,
    return
  }
  func.func @transform_0(%arg0: i32) -> (i32, i32) {
    %c0_i32 = arith.constant 0 : i32
    %c0_i32_0 = arith.constant 0 : i32
    return %arg0, %c0_i32 : i32, i32
  }
  func.func @transform_1(%arg0: i32) -> (i32, i32) {
    %c0_i32 = arith.constant 0 : i32
    %c0_i32_0 = arith.constant 0 : i32
    %c0_i32_1 = arith.constant 0 : i32
    return %c0_i32, %c0_i32_0 : i32, i32
  }
  func.func @transform_2(%arg0: i32) -> (i32, i32) {
    %c0_i32 = arith.constant 0 : i32
    %c0_i32_0 = arith.constant 0 : i32
    %c0_i32_1 = arith.constant 0 : i32
    return %c0_i32, %c0_i32_0 : i32, i32
  }
  func.func @transform_3(%arg0: i32) -> (i32, i32) {
    %c0_i32 = arith.constant 0 : i32
    %c0_i32_0 = arith.constant 0 : i32
    %c0_i32_1 = arith.constant 0 : i32
    return %c0_i32, %c0_i32_0 : i32, i32
  }
  func.func @transform_4(%arg0: i32) -> (i32, i32) {
    %c0_i32 = arith.constant 0 : i32
    %c0_i32_0 = arith.constant 0 : i32
    return %c0_i32, %arg0 : i32, i32
  }
}

</mosaic_0001>

<bundles_post_ra>
// kernel: net_forward.1
= control target key start
LH: loop header
LB: loop body
LE: loop exit
PB: predicated region body
PF: predicated region fallthrough
CT: control target
= control target key end

     0   :  { %v412_v1 = vmov 0.0   ;;  %vm76_vm0 = vcmask 261120   ;;  %s488_s0 = inlined_call_operand.vmem [shape: bf16[8,32], index: 0, kind: input, shape index: {}]   ;;  %s489_s1 = inlined_call_operand.vmem [shape: bf16[8,32], index: 1, kind: input, shape index: {}]   ;;  %s490_s2 = inlined_call_operand.vmem [shape: f32[8,8], index: 2, kind: input, shape index: {}]   ;;  %s491_s3 = inlined_call_operand.vmem [shape: f32[8,8], index: 3, kind: input, shape index: {}]   ;;  %s492_s4 = inlined_call_operand.hbm [shape: f32[1,8], index: 4, kind: output, shape index: {}]  }
   0x1   :  { %v378_v0 = vld [vmem:[%s488_s0 + $0x38] sm:$0xff]   ;;  %345 = vmatprep.subr.bf16.mxu0 %v412_v1  ;;  %365 = vmatprep.subr.mxu1 %v412_v1  ;;  %v379_v3 = vld [vmem:[%s488_s0 + $0x30] sm:$0xff]  }
   0x2   :  { %v102_v2 = vsel %vm76_vm0, %v378_v0, 0  ;;  %v99_v4 = vsel %vm76_vm0, %v379_v3, 0 }
   0x3   :  { %346 = vmatpush3.bf16.xpose.msra.mxu0 %v102_v2 }
   0x4   :  { %347 = vmatprep.subr.bf16.mxu0 %v412_v1 }
   0x5   :  { %9 = vsyncpa [#allocation3], 0  ;;  %vm413_vm1 = vmmov 0   ;;  %v380_v5 = vld [vmem:[%s488_s0 + $0x28] sm:$0xff]   ;;  %v381_v7 = vld [vmem:[%s488_s0 + $0x20] sm:$0xff]   ;;  %vm148_vm3 = vcmask 64512  }
   0x6   :  { %361 = vmatprep.mubr.msk.bf16.mxu0 %vm413_vm1, %v412_v1  ;;  %367 = vmatprep.mubr.msk.f32.mxu1 %vm413_vm1, %v412_v1  ;;  %v96_v6 = vsel %vm76_vm0, %v380_v5, 0  ;;  %v93_v8 = vsel %vm76_vm0, %v381_v7, 0  ;;  %v382_v9 = vld [vmem:[%s488_s0 + $0x18] sm:$0xff]   ;;  %v383_v11 = vld [vmem:[%s488_s0 + $0x10] sm:$0xff]   ;;  %v384_v13 = vld [vmem:[%s488_s0 + $0x8] sm:$0xff]  }
   0x7   :  { %v90_v10 = vsel %vm76_vm0, %v382_v9, 0  ;;  %v87_v12 = vsel %vm76_vm0, %v383_v11, 0  ;;  %v84_v14 = vsel %vm76_vm0, %v384_v13, 0  ;;  %v385_v15 = vld [vmem:[%s488_s0] sm:$0xff]  }
   0x8   :  { %v81_v16 = vsel %vm76_vm0, %v385_v15, 0  ;;  %v19_v17 = vld [vmem:[%s489_s1] sm:$0xf] }
   0x9   :  { %v147_v21 = vld [vmem:[%s490_s2] sm:$0xff]  ;;  %s414_s2 = smov [#allocation2]  }
   0xa   :  { %v225_v28 = vld [vmem:[%s491_s3] sm:$0xff]  ;;  %s312_s9 = sshll.u32 %s414_s2, 4  ;;  %s313_s9 = int_to_ptr.vmem [resolvable:$true] %s312_s9 }
   0xb   :  { %348 = vmatpush3.bf16.xpose.msra.mxu0 %v99_v4  ;;  %s390_s10 = scalar_lea.vmem %s313_s9, 16  ;;  %s394_s11 = scalar_lea.vmem %s313_s9, 32 }
   0xc   :  { %349 = vmatprep.subr.bf16.mxu0 %v412_v1  ;;  %p391_p0 = scmp.ne.s32.totalorder %s313_s9, %s390_s10  ;;  %p395_p1 = scmp.lt.s32.totalorder %s313_s9, %s313_s9 }
   0xd   :  { %p396_p2 = scmp.lt.s32.totalorder %s394_s11, %s390_s10 }
   0xf   :  { %p397_p3 = por %p396_p2, %p395_p1 }
  0x11   :  { %p398_p4 = pnand %p397_p3, %p391_p0 }
  0x13   :  { %350 = vmatpush3.bf16.xpose.msra.mxu0 %v96_v6 }
  0x14   :  { %351 = vmatprep.subr.bf16.mxu0 %v412_v1 }
  0x1b   :  { %352 = vmatpush3.bf16.xpose.msra.mxu0 %v93_v8 }
  0x1c   :  { %353 = vmatprep.subr.bf16.mxu0 %v412_v1 }
  0x23   :  { %354 = vmatpush3.bf16.xpose.msra.mxu0 %v90_v10 }
  0x24   :  { %355 = vmatprep.subr.bf16.mxu0 %v412_v1 }
  0x2b   :  { %356 = vmatpush3.bf16.xpose.msra.mxu0 %v87_v12 }
  0x2c   :  { %357 = vmatprep.subr.bf16.mxu0 %v412_v1 }
  0x33   :  { %358 = vmatpush3.bf16.xpose.msra.mxu0 %v84_v14 }
  0x34   :  { %359 = vmatprep.subr.bf16.mxu0 %v412_v1 }
  0x3b   :  { %360 = vmatpush3.bf16.xpose.msra.mxu0 %v81_v16 }
  0x42   :  { %362 = vmatmul.mubr.msk.bf16.vlgmr.msra.gmra.mxu0 %vm76_vm0, %v19_v17 }
 0x102   :  { %v138_v18 = vpop.f32.mrf.mxu0 }
 0x103   :  { %v145_v19 = vmul.f32 0.01, %v138_v18  ;;  %vm144_vm2 = vcmp.gt.f32.partialorder %v138_v18, 0.0 }
 0x104   :  { %v363_v20 = vpop.f32.mrf.mxu0 }
 0x105   :  { %v146_v22 = vsel %vm144_vm2, %v138_v18, %v145_v19 }
 0x106   :  { %v141_v23 = vpop.f32.mrf.mxu0  ;;  %366 = vmatpush3.msra.mxu1 %v146_v22 }
 0x107   :  { %368 = vmatmul.mubr.msk.f32.vlgmr.msra.gmra.mxu1 %vm148_vm3, %v147_v21  ;;  %370 = vmatprep.subr.mxu1 %v412_v1 }
 0x108   :  { %v364_v24 = vpop.f32.mrf.mxu0  ;;  %372 = vmatprep.mubr.msk.f32.mxu1 %vm413_vm1, %v412_v1 }
 0x1c7   :  { %v218_v25 = vpop.f32.mrf.mxu1 }
 0x1c8   :  { %vm222_vm4 = vcmp.gt.f32.partialorder %v218_v25, 0.0  ;;  %v223_v26 = vmul.f32 0.01, %v218_v25 }
 0x1c9   :  { %v369_v27 = vpop.f32.mrf.mxu1 }
 0x1ca   :  { %v224_v29 = vsel %vm222_vm4, %v218_v25, %v223_v26 }
 0x1cb   :  { %371 = vmatpush3.msra.mxu1 %v224_v29 }
 0x1cc   :  { %373 = vmatmul.mubr.msk.f32.vlgmr.msra.gmra.mxu1 %vm148_vm3, %v225_v28 }
 0x28c   :  { %v295_v30 = vpop.f32.mrf.mxu1 }
 0x28d   :  { %v331_v31 = vmul.f32 -1.442695, %v295_v30 }
 0x28e   :  { %v374_v32 = vpop.f32.mrf.mxu1 }
 0x28f   :  { %386 = vpow2.f32 %v331_v31 }
 0x29c   :  { %v387_v33 = vpop.eup %386 }
 0x29d   :  { %v302_v34 = vadd.f32 1.0, %v387_v33 }
 0x29f   :  { %388 = vrcp.f32 %v302_v34 }
 0x2ac   :  { %v389_v35 = vpop.eup %388 }
 0x2ad   :  { %305 = vst [vmem:[#allocation2] sm:$0x1] %v389_v35 }
 0x2ae   :  { %401 = shalt.err (!%p398_p4)
}
 0x2af   :  { %315 = dma.vmem_to_hbm [thread:$0]  %s313_s9, 16, %s492_s4, [#allocation3]  }
 0x2b0   :  { %410 = dma.done.wait [#allocation3], 16  }
 0x2b1   :  { %411 = vsyncadd [#allocation3], 4294967280 }
 0x2b2   :  { %319 = vsyncpa [#allocation3], 1 }

</bundles_post_ra>
